<compile_context>
chip_gen: v5e
topology: v5e:2x2
jax: 0.10.0
libtpu: 0.0.40
codegen_flags: <defaults>
</compile_context>

<pallas_src>
import functools

import jax
import jax.numpy as jnp
from jax.experimental import pallas as pl
from jax.experimental.pallas import tpu as pltpu


def _layernorm(x, gamma, beta, eps=1e-8):
    mean = jnp.mean(x, axis=-1, keepdims=True)
    var = jnp.mean((x - mean) ** 2, axis=-1, keepdims=True)
    return (x - mean) * jax.lax.rsqrt(var + eps) * gamma + beta


def transformer_block_kernel(
    q_ref, k_ref, v_ref, mbias_ref, w_ref, p_ref, out_ref,
    *, batch, seq, num_head,
):
    f32 = jnp.float32
    bf16 = jnp.bfloat16

    d_model = out_ref.shape[-1]
    dh = d_model // num_head

    # Packed parameter slab: rows are [bq, bk, bv, bo, b1, b2, g0, be0, g1, be1].
    P = p_ref[...]                            # (10, D) f32
    bq, bk, bv, bo = P[0:1], P[1:2], P[2:3], P[3:4]
    b1, b2 = P[4:5], P[5:6]
    ln0_g, ln0_b = P[6:7], P[7:8]
    ln1_g, ln1_b = P[8:9], P[9:10]

    k_res = k_ref[...]                        # (B*S, D) f32 — residual path stays f32

    # ---- full-width QKV projections over ALL B*S rows (bf16 MXU, f32 acc) ----
    # w_ref is (6, D, D) bf16: [Wq*scale, Wk, Wv, Wo, W1, W2].
    q_all = jnp.dot(q_ref[...].astype(bf16), w_ref[0], preferred_element_type=f32) + bq
    k_all = jnp.dot(k_res.astype(bf16),      w_ref[1], preferred_element_type=f32) + bk
    v_all = jnp.dot(v_ref[...].astype(bf16), w_ref[2], preferred_element_type=f32) + bv

    # ---- scaled dot-product attention (static unroll; S=8 tiles are tiny) ----
    pv_rows = []
    for b in range(batch):
        r0 = b * seq
        mb = mbias_ref[b]                     # (S, S) f32 additive mask (0 / -1e9)
        heads = []
        for h in range(num_head):
            c0 = h * dh
            Qh = q_all[r0:r0 + seq, c0:c0 + dh]   # static lane slice, same 128-lane tile
            Kh = k_all[r0:r0 + seq, c0:c0 + dh]
            Vh = v_all[r0:r0 + seq, c0:c0 + dh]

            # scale 1/sqrt(Dh) already folded into Wq/bq
            s = jnp.einsum("qd,kd->qk", Qh, Kh, preferred_element_type=f32) + mb
            m = jnp.max(s, axis=-1, keepdims=True)
            e = jnp.exp(s - m)
            p = e * pl.reciprocal(jnp.sum(e, axis=-1, keepdims=True), approx=True)

            heads.append(jnp.dot(p, Vh, preferred_element_type=f32))   # (S, Dh)
        pv_rows.append(jnp.concatenate(heads, axis=-1))                # (S, D)
    pv = jnp.concatenate(pv_rows, axis=0)                              # (B*S, D)

    # ---- single full-width output projection for all batches/heads ----
    attn = jnp.dot(pv.astype(bf16), w_ref[3], preferred_element_type=f32) + bo

    # ---- residual with `key` + LayerNorm 0 ----
    x1 = _layernorm(k_res + attn, ln0_g, ln0_b)

    # ---- position-wise FFN (batched over all B*S rows) ----
    h1 = jnp.maximum(
        jnp.dot(x1.astype(bf16), w_ref[4], preferred_element_type=f32) + b1, 0.0)
    ffn = jnp.dot(h1.astype(bf16), w_ref[5], preferred_element_type=f32) + b2

    # ---- residual + LayerNorm 1 ----
    out = _layernorm(x1 + ffn, ln1_g, ln1_b)
    out_ref[...] = out.astype(out_ref.dtype)


def transformer_block(query, key, value, mask, params, *, num_head):
    B, S, D = query.shape
    assert D % num_head == 0
    Dh = D // num_head
    f32, bf16 = jnp.float32, jnp.bfloat16
    scale = 1.0 / (Dh ** 0.5)

    # One stacked (6, D, D) bf16 weight slab: [Wq*scale, Wk, Wv, Wo, W1, W2].
    w_all = jnp.stack(
        [params["wq"] * scale, params["wk"], params["wv"],
         params["wo"], params["w1"], params["w2"]], axis=0).astype(bf16)

    # One stacked (10, D) f32 bias / LayerNorm slab.
    p_all = jnp.concatenate(
        [(params["bq"] * scale).reshape(1, D),
         params["bk"].reshape(1, D),
         params["bv"].reshape(1, D),
         params["bo"].reshape(1, D),
         params["b1"].reshape(1, D),
         params["b2"].reshape(1, D),
         params["ln0_g"].reshape(1, D),
         params["ln0_b"].reshape(1, D),
         params["ln1_g"].reshape(1, D),
         params["ln1_b"].reshape(1, D)], axis=0).astype(f32)

    # Additive mask bias, computed once outside the kernel, shipped in f32.
    mbias = jnp.where(mask == 0, jnp.float32(-1e9), jnp.float32(0.0)).astype(f32)

    # Batch folded into the row dimension — position-wise ops run over B*S rows.
    q2 = query.reshape(B * S, D).astype(f32)
    k2 = key.reshape(B * S, D).astype(f32)
    v2 = value.reshape(B * S, D).astype(f32)

    kernel = functools.partial(
        transformer_block_kernel, batch=B, seq=S, num_head=num_head)

    # Whole problem in one invocation: every operand is a single resident VMEM
    # block (no grid -> no per-step overhead, weights loaded exactly once).
    vmem = pl.BlockSpec(memory_space=pltpu.MemorySpace.VMEM)
    args = (q2, k2, v2, mbias, w_all, p_all)

    out = pl.pallas_call(
        kernel,
        out_shape=jax.ShapeDtypeStruct((B * S, D), jnp.float32),
        in_specs=[vmem] * len(args),
        out_specs=vmem,
    )(*args)
    return out.reshape(B, S, D)


# -------- pure-JAX f32 reference (mirrors the PyTorch forward) --------
def reference_block(query, key, value, mask, params, *, num_head):
    B, S, D = query.shape
    head_dim = D // num_head

    def lin(x, w, b):
        return x @ w + b

    Q = lin(query, params["wq"], params["bq"]).reshape(B, S, num_head, head_dim).transpose(0, 2, 1, 3)
    K = lin(key, params["wk"], params["bk"]).reshape(B, S, num_head, head_dim).transpose(0, 2, 1, 3)
    V = lin(value, params["wv"], params["bv"]).reshape(B, S, num_head, head_dim).transpose(0, 2, 1, 3)

    scores = jnp.einsum("bhqd,bhkd->bhqk", Q, K) / jnp.sqrt(jnp.float32(head_dim))
    scores = jnp.where(mask[:, None, :, :] == 0, -1e9, scores)
    p = jax.nn.softmax(scores, axis=-1)
    attn = jnp.einsum("bhqk,bhkd->bhqd", p, V).transpose(0, 2, 1, 3).reshape(B, S, D)
    attn = lin(attn, params["wo"], params["bo"])

    def ln(x, g, b, eps=1e-8):
        mu = jnp.mean(x, axis=-1, keepdims=True)
        var = jnp.mean((x - mu) ** 2, axis=-1, keepdims=True)
        return (x - mu) / jnp.sqrt(var + eps) * g + b

    x1 = ln(key + attn, params["ln0_g"], params["ln0_b"])
    ffn = jnp.maximum(x1 @ params["w1"] + params["b1"], 0.0) @ params["w2"] + params["b2"]
    return ln(x1 + ffn, params["ln1_g"], params["ln1_b"])


if __name__ == "__main__":
    B, S, D, H = 2, 8, 32, 4

    key0 = jax.random.PRNGKey(0)
    ks = jax.random.split(key0, 16)

    def w(k, shape, scale=0.05):
        return (scale * jax.random.normal(k, shape)).astype(jnp.float32)

    params = {
        "wq": w(ks[0], (D, D)), "bq": w(ks[1], (1, D)),
        "wk": w(ks[2], (D, D)), "bk": w(ks[3], (1, D)),
        "wv": w(ks[4], (D, D)), "bv": w(ks[5], (1, D)),
        "wo": w(ks[6], (D, D)), "bo": w(ks[7], (1, D)),
        "ln0_g": jnp.ones((1, D), jnp.float32) + w(ks[8], (1, D)),
        "ln0_b": w(ks[9], (1, D)),
        "w1": w(ks[10], (D, D)), "b1": w(ks[11], (1, D)),
        "w2": w(ks[12], (D, D)), "b2": w(ks[13], (1, D)),
        "ln1_g": jnp.ones((1, D), jnp.float32) + w(ks[14], (1, D)),
        "ln1_b": w(ks[15], (1, D)),
    }

    dk = jax.random.split(jax.random.PRNGKey(1), 3)
    query = jax.random.normal(dk[0], (B, S, D), jnp.float32)
    key_t = jax.random.normal(dk[1], (B, S, D), jnp.float32)
    value = jax.random.normal(dk[2], (B, S, D), jnp.float32)
    # causal mask, (B, S, S), 1 = attend, 0 = masked
    mask = jnp.broadcast_to(jnp.tril(jnp.ones((S, S), jnp.float32)), (B, S, S))

    out = transformer_block(query, key_t, value, mask, params, num_head=H)
    out = jax.block_until_ready(out)

    ref = reference_block(query, key_t, value, mask, params, num_head=H)
    assert out.shape == (B, S, D)
    # bf16 MXU weights + approx reciprocal vs f32 reference: errors are O(1e-3);
    # 2e-2 leaves ample margin.
    assert jnp.max(jnp.abs(out - ref)) < 2e-2, "mismatch vs JAX reference"

    print("KERNEL_OK")
</pallas_src>

<mosaic_0001>
module attributes {stable_mosaic.version = 11 : i64} {
  func.func @transformer_block_kernel(%arg0: memref<16x32xf32, #tpu.memory_space<vmem>>, %arg1: memref<16x32xf32, #tpu.memory_space<vmem>>, %arg2: memref<16x32xf32, #tpu.memory_space<vmem>>, %arg3: memref<2x8x8xf32, #tpu.memory_space<vmem>>, %arg4: memref<6x32x32xbf16, #tpu.memory_space<vmem>>, %arg5: memref<10x32xf32, #tpu.memory_space<vmem>>, %arg6: memref<16x32xf32, #tpu.memory_space<vmem>>) attributes {dimension_semantics = [], scalar_prefetch = 0 : i64, scratch_operands = 0 : i64, tpu.core_type = #tpu.core_type<tc>} {
    %c0 = arith.constant 0 : index
    %c0_0 = arith.constant 0 : index
    %0 = vector.load %arg5[%c0, %c0_0] : memref<10x32xf32, #tpu.memory_space<vmem>>, vector<10x32xf32>
    %1 = vector.extract_strided_slice %0 {offsets = [0, 0], sizes = [1, 32], strides = [1, 1]} : vector<10x32xf32> to vector<1x32xf32>
    %2 = vector.extract_strided_slice %0 {offsets = [1, 0], sizes = [1, 32], strides = [1, 1]} : vector<10x32xf32> to vector<1x32xf32>
    %3 = vector.extract_strided_slice %0 {offsets = [2, 0], sizes = [1, 32], strides = [1, 1]} : vector<10x32xf32> to vector<1x32xf32>
    %4 = vector.extract_strided_slice %0 {offsets = [3, 0], sizes = [1, 32], strides = [1, 1]} : vector<10x32xf32> to vector<1x32xf32>
    %5 = vector.extract_strided_slice %0 {offsets = [4, 0], sizes = [1, 32], strides = [1, 1]} : vector<10x32xf32> to vector<1x32xf32>
    %6 = vector.extract_strided_slice %0 {offsets = [5, 0], sizes = [1, 32], strides = [1, 1]} : vector<10x32xf32> to vector<1x32xf32>
    %7 = vector.extract_strided_slice %0 {offsets = [6, 0], sizes = [1, 32], strides = [1, 1]} : vector<10x32xf32> to vector<1x32xf32>
    %8 = vector.extract_strided_slice %0 {offsets = [7, 0], sizes = [1, 32], strides = [1, 1]} : vector<10x32xf32> to vector<1x32xf32>
    %9 = vector.extract_strided_slice %0 {offsets = [8, 0], sizes = [1, 32], strides = [1, 1]} : vector<10x32xf32> to vector<1x32xf32>
    %10 = vector.extract_strided_slice %0 {offsets = [9, 0], sizes = [1, 32], strides = [1, 1]} : vector<10x32xf32> to vector<1x32xf32>
    %c0_1 = arith.constant 0 : index
    %c0_2 = arith.constant 0 : index
    %11 = vector.load %arg1[%c0_1, %c0_2] : memref<16x32xf32, #tpu.memory_space<vmem>>, vector<16x32xf32>
    %c0_3 = arith.constant 0 : index
    %c0_4 = arith.constant 0 : index
    %12 = vector.load %arg0[%c0_3, %c0_4] : memref<16x32xf32, #tpu.memory_space<vmem>>, vector<16x32xf32>
    %13 = arith.truncf %12 : vector<16x32xf32> to vector<16x32xbf16>
    %c0_5 = arith.constant 0 : index
    %c0_6 = arith.constant 0 : index
    %c0_7 = arith.constant 0 : index
    %14 = vector.load %arg4[%c0_5, %c0_6, %c0_7] : memref<6x32x32xbf16, #tpu.memory_space<vmem>>, vector<1x32x32xbf16>
    %15 = vector.shape_cast %14 : vector<1x32x32xbf16> to vector<32x32xbf16>
    %cst = arith.constant dense<0.000000e+00> : vector<16x32xf32>
    %16 = tpu.matmul %13, %15, %cst {dimension_numbers = #tpu.dot_dimension_numbers<[1], [0], [0], [1], [0, 0, 1, 1], [], []>} : vector<16x32xbf16>, vector<32x32xbf16>, vector<16x32xf32> -> vector<16x32xf32>
    %17 = vector.broadcast %1 : vector<1x32xf32> to vector<16x32xf32>
    %18 = arith.addf %16, %17 : vector<16x32xf32>
    %19 = arith.truncf %11 : vector<16x32xf32> to vector<16x32xbf16>
    %c1 = arith.constant 1 : index
    %c0_8 = arith.constant 0 : index
    %c0_9 = arith.constant 0 : index
    %20 = vector.load %arg4[%c1, %c0_8, %c0_9] : memref<6x32x32xbf16, #tpu.memory_space<vmem>>, vector<1x32x32xbf16>
    %21 = vector.shape_cast %20 : vector<1x32x32xbf16> to vector<32x32xbf16>
    %cst_10 = arith.constant dense<0.000000e+00> : vector<16x32xf32>
    %22 = tpu.matmul %19, %21, %cst_10 {dimension_numbers = #tpu.dot_dimension_numbers<[1], [0], [0], [1], [0, 0, 1, 1], [], []>} : vector<16x32xbf16>, vector<32x32xbf16>, vector<16x32xf32> -> vector<16x32xf32>
    %23 = vector.broadcast %2 : vector<1x32xf32> to vector<16x32xf32>
    %24 = arith.addf %22, %23 : vector<16x32xf32>
    %c0_11 = arith.constant 0 : index
    %c0_12 = arith.constant 0 : index
    %25 = vector.load %arg2[%c0_11, %c0_12] : memref<16x32xf32, #tpu.memory_space<vmem>>, vector<16x32xf32>
    %26 = arith.truncf %25 : vector<16x32xf32> to vector<16x32xbf16>
    %c2 = arith.constant 2 : index
    %c0_13 = arith.constant 0 : index
    %c0_14 = arith.constant 0 : index
    %27 = vector.load %arg4[%c2, %c0_13, %c0_14] : memref<6x32x32xbf16, #tpu.memory_space<vmem>>, vector<1x32x32xbf16>
    %28 = vector.shape_cast %27 : vector<1x32x32xbf16> to vector<32x32xbf16>
    %cst_15 = arith.constant dense<0.000000e+00> : vector<16x32xf32>
    %29 = tpu.matmul %26, %28, %cst_15 {dimension_numbers = #tpu.dot_dimension_numbers<[1], [0], [0], [1], [0, 0, 1, 1], [], []>} : vector<16x32xbf16>, vector<32x32xbf16>, vector<16x32xf32> -> vector<16x32xf32>
    %30 = vector.broadcast %3 : vector<1x32xf32> to vector<16x32xf32>
    %31 = arith.addf %29, %30 : vector<16x32xf32>
    %c0_16 = arith.constant 0 : index
    %c0_17 = arith.constant 0 : index
    %c0_18 = arith.constant 0 : index
    %32 = vector.load %arg3[%c0_16, %c0_17, %c0_18] : memref<2x8x8xf32, #tpu.memory_space<vmem>>, vector<1x8x8xf32>
    %33 = vector.shape_cast %32 : vector<1x8x8xf32> to vector<8x8xf32>
    %34 = vector.extract_strided_slice %18 {offsets = [0, 0], sizes = [8, 8], strides = [1, 1]} : vector<16x32xf32> to vector<8x8xf32>
    %35 = vector.extract_strided_slice %24 {offsets = [0, 0], sizes = [8, 8], strides = [1, 1]} : vector<16x32xf32> to vector<8x8xf32>
    %36 = vector.extract_strided_slice %31 {offsets = [0, 0], sizes = [8, 8], strides = [1, 1]} : vector<16x32xf32> to vector<8x8xf32>
    "tpu.trace_start"() <{level = 10 : i32, message = "qd,kd->qk"}> : () -> ()
    %cst_19 = arith.constant dense<0.000000e+00> : vector<8x8xf32>
    %37 = tpu.matmul %34, %35, %cst_19 {dimension_numbers = #tpu.dot_dimension_numbers<[1], [1], [0], [0], [0, 0, 1, 0], [], []>} : vector<8x8xf32>, vector<8x8xf32>, vector<8x8xf32> -> vector<8x8xf32>
    "tpu.trace_stop"() : () -> ()
    %38 = arith.addf %37, %33 : vector<8x8xf32>
    %cst_20 = arith.constant dense<0xFF800000> : vector<8xf32>
    %39 = vector.multi_reduction <maximumf>, %38, %cst_20 [1] : vector<8x8xf32> to vector<8xf32>
    %40 = vector.shape_cast %39 : vector<8xf32> to vector<8x1xf32>
    %41 = vector.broadcast %40 : vector<8x1xf32> to vector<8x8xf32>
    %42 = arith.subf %38, %41 : vector<8x8xf32>
    %43 = math.exp %42 : vector<8x8xf32>
    %cst_21 = arith.constant dense<0.000000e+00> : vector<8xf32>
    %44 = vector.multi_reduction <add>, %43, %cst_21 [1] : vector<8x8xf32> to vector<8xf32>
    %45 = vector.shape_cast %44 : vector<8xf32> to vector<8x1xf32>
    %46 = tpu.reciprocal %45 {approx = true} : vector<8x1xf32> -> vector<8x1xf32>
    %47 = vector.broadcast %46 : vector<8x1xf32> to vector<8x8xf32>
    %48 = arith.mulf %43, %47 : vector<8x8xf32>
    %cst_22 = arith.constant dense<0.000000e+00> : vector<8x8xf32>
    %49 = tpu.matmul %48, %36, %cst_22 {dimension_numbers = #tpu.dot_dimension_numbers<[1], [0], [0], [1], [0, 0, 1, 1], [], []>} : vector<8x8xf32>, vector<8x8xf32>, vector<8x8xf32> -> vector<8x8xf32>
    %50 = vector.extract_strided_slice %18 {offsets = [0, 8], sizes = [8, 8], strides = [1, 1]} : vector<16x32xf32> to vector<8x8xf32>
    %51 = vector.extract_strided_slice %24 {offsets = [0, 8], sizes = [8, 8], strides = [1, 1]} : vector<16x32xf32> to vector<8x8xf32>
    %52 = vector.extract_strided_slice %31 {offsets = [0, 8], sizes = [8, 8], strides = [1, 1]} : vector<16x32xf32> to vector<8x8xf32>
    "tpu.trace_start"() <{level = 10 : i32, message = "qd,kd->qk"}> : () -> ()
    %cst_23 = arith.constant dense<0.000000e+00> : vector<8x8xf32>
    %53 = tpu.matmul %50, %51, %cst_23 {dimension_numbers = #tpu.dot_dimension_numbers<[1], [1], [0], [0], [0, 0, 1, 0], [], []>} : vector<8x8xf32>, vector<8x8xf32>, vector<8x8xf32> -> vector<8x8xf32>
    "tpu.trace_stop"() : () -> ()
    %54 = arith.addf %53, %33 : vector<8x8xf32>
    %cst_24 = arith.constant dense<0xFF800000> : vector<8xf32>
    %55 = vector.multi_reduction <maximumf>, %54, %cst_24 [1] : vector<8x8xf32> to vector<8xf32>
    %56 = vector.shape_cast %55 : vector<8xf32> to vector<8x1xf32>
    %57 = vector.broadcast %56 : vector<8x1xf32> to vector<8x8xf32>
    %58 = arith.subf %54, %57 : vector<8x8xf32>
    %59 = math.exp %58 : vector<8x8xf32>
    %cst_25 = arith.constant dense<0.000000e+00> : vector<8xf32>
    %60 = vector.multi_reduction <add>, %59, %cst_25 [1] : vector<8x8xf32> to vector<8xf32>
    %61 = vector.shape_cast %60 : vector<8xf32> to vector<8x1xf32>
    %62 = tpu.reciprocal %61 {approx = true} : vector<8x1xf32> -> vector<8x1xf32>
    %63 = vector.broadcast %62 : vector<8x1xf32> to vector<8x8xf32>
    %64 = arith.mulf %59, %63 : vector<8x8xf32>
    %cst_26 = arith.constant dense<0.000000e+00> : vector<8x8xf32>
    %65 = tpu.matmul %64, %52, %cst_26 {dimension_numbers = #tpu.dot_dimension_numbers<[1], [0], [0], [1], [0, 0, 1, 1], [], []>} : vector<8x8xf32>, vector<8x8xf32>, vector<8x8xf32> -> vector<8x8xf32>
    %66 = vector.extract_strided_slice %18 {offsets = [0, 16], sizes = [8, 8], strides = [1, 1]} : vector<16x32xf32> to vector<8x8xf32>
    %67 = vector.extract_strided_slice %24 {offsets = [0, 16], sizes = [8, 8], strides = [1, 1]} : vector<16x32xf32> to vector<8x8xf32>
    %68 = vector.extract_strided_slice %31 {offsets = [0, 16], sizes = [8, 8], strides = [1, 1]} : vector<16x32xf32> to vector<8x8xf32>
    "tpu.trace_start"() <{level = 10 : i32, message = "qd,kd->qk"}> : () -> ()
    %cst_27 = arith.constant dense<0.000000e+00> : vector<8x8xf32>
    %69 = tpu.matmul %66, %67, %cst_27 {dimension_numbers = #tpu.dot_dimension_numbers<[1], [1], [0], [0], [0, 0, 1, 0], [], []>} : vector<8x8xf32>, vector<8x8xf32>, vector<8x8xf32> -> vector<8x8xf32>
    "tpu.trace_stop"() : () -> ()
    %70 = arith.addf %69, %33 : vector<8x8xf32>
    %cst_28 = arith.constant dense<0xFF800000> : vector<8xf32>
    %71 = vector.multi_reduction <maximumf>, %70, %cst_28 [1] : vector<8x8xf32> to vector<8xf32>
    %72 = vector.shape_cast %71 : vector<8xf32> to vector<8x1xf32>
    %73 = vector.broadcast %72 : vector<8x1xf32> to vector<8x8xf32>
    %74 = arith.subf %70, %73 : vector<8x8xf32>
    %75 = math.exp %74 : vector<8x8xf32>
    %cst_29 = arith.constant dense<0.000000e+00> : vector<8xf32>
    %76 = vector.multi_reduction <add>, %75, %cst_29 [1] : vector<8x8xf32> to vector<8xf32>
    %77 = vector.shape_cast %76 : vector<8xf32> to vector<8x1xf32>
    %78 = tpu.reciprocal %77 {approx = true} : vector<8x1xf32> -> vector<8x1xf32>
    %79 = vector.broadcast %78 : vector<8x1xf32> to vector<8x8xf32>
    %80 = arith.mulf %75, %79 : vector<8x8xf32>
    %cst_30 = arith.constant dense<0.000000e+00> : vector<8x8xf32>
    %81 = tpu.matmul %80, %68, %cst_30 {dimension_numbers = #tpu.dot_dimension_numbers<[1], [0], [0], [1], [0, 0, 1, 1], [], []>} : vector<8x8xf32>, vector<8x8xf32>, vector<8x8xf32> -> vector<8x8xf32>
    %82 = vector.extract_strided_slice %18 {offsets = [0, 24], sizes = [8, 8], strides = [1, 1]} : vector<16x32xf32> to vector<8x8xf32>
    %83 = vector.extract_strided_slice %24 {offsets = [0, 24], sizes = [8, 8], strides = [1, 1]} : vector<16x32xf32> to vector<8x8xf32>
    %84 = vector.extract_strided_slice %31 {offsets = [0, 24], sizes = [8, 8], strides = [1, 1]} : vector<16x32xf32> to vector<8x8xf32>
    "tpu.trace_start"() <{level = 10 : i32, message = "qd,kd->qk"}> : () -> ()
    %cst_31 = arith.constant dense<0.000000e+00> : vector<8x8xf32>
    %85 = tpu.matmul %82, %83, %cst_31 {dimension_numbers = #tpu.dot_dimension_numbers<[1], [1], [0], [0], [0, 0, 1, 0], [], []>} : vector<8x8xf32>, vector<8x8xf32>, vector<8x8xf32> -> vector<8x8xf32>
    "tpu.trace_stop"() : () -> ()
    %86 = arith.addf %85, %33 : vector<8x8xf32>
    %cst_32 = arith.constant dense<0xFF800000> : vector<8xf32>
    %87 = vector.multi_reduction <maximumf>, %86, %cst_32 [1] : vector<8x8xf32> to vector<8xf32>
    %88 = vector.shape_cast %87 : vector<8xf32> to vector<8x1xf32>
    %89 = vector.broadcast %88 : vector<8x1xf32> to vector<8x8xf32>
    %90 = arith.subf %86, %89 : vector<8x8xf32>
    %91 = math.exp %90 : vector<8x8xf32>
    %cst_33 = arith.constant dense<0.000000e+00> : vector<8xf32>
    %92 = vector.multi_reduction <add>, %91, %cst_33 [1] : vector<8x8xf32> to vector<8xf32>
    %93 = vector.shape_cast %92 : vector<8xf32> to vector<8x1xf32>
    %94 = tpu.reciprocal %93 {approx = true} : vector<8x1xf32> -> vector<8x1xf32>
    %95 = vector.broadcast %94 : vector<8x1xf32> to vector<8x8xf32>
    %96 = arith.mulf %91, %95 : vector<8x8xf32>
    %cst_34 = arith.constant dense<0.000000e+00> : vector<8x8xf32>
    %97 = tpu.matmul %96, %84, %cst_34 {dimension_numbers = #tpu.dot_dimension_numbers<[1], [0], [0], [1], [0, 0, 1, 1], [], []>} : vector<8x8xf32>, vector<8x8xf32>, vector<8x8xf32> -> vector<8x8xf32>
    %98 = tpu.concatenate %49, %65, %81, %97 in 1 : vector<8x8xf32>, vector<8x8xf32>, vector<8x8xf32>, vector<8x8xf32> -> vector<8x32xf32>
    %c1_35 = arith.constant 1 : index
    %c0_36 = arith.constant 0 : index
    %c0_37 = arith.constant 0 : index
    %99 = vector.load %arg3[%c1_35, %c0_36, %c0_37] : memref<2x8x8xf32, #tpu.memory_space<vmem>>, vector<1x8x8xf32>
    %100 = vector.shape_cast %99 : vector<1x8x8xf32> to vector<8x8xf32>
    %101 = vector.extract_strided_slice %18 {offsets = [8, 0], sizes = [8, 8], strides = [1, 1]} : vector<16x32xf32> to vector<8x8xf32>
    %102 = vector.extract_strided_slice %24 {offsets = [8, 0], sizes = [8, 8], strides = [1, 1]} : vector<16x32xf32> to vector<8x8xf32>
    %103 = vector.extract_strided_slice %31 {offsets = [8, 0], sizes = [8, 8], strides = [1, 1]} : vector<16x32xf32> to vector<8x8xf32>
    "tpu.trace_start"() <{level = 10 : i32, message = "qd,kd->qk"}> : () -> ()
    %cst_38 = arith.constant dense<0.000000e+00> : vector<8x8xf32>
    %104 = tpu.matmul %101, %102, %cst_38 {dimension_numbers = #tpu.dot_dimension_numbers<[1], [1], [0], [0], [0, 0, 1, 0], [], []>} : vector<8x8xf32>, vector<8x8xf32>, vector<8x8xf32> -> vector<8x8xf32>
    "tpu.trace_stop"() : () -> ()
    %105 = arith.addf %104, %100 : vector<8x8xf32>
    %cst_39 = arith.constant dense<0xFF800000> : vector<8xf32>
    %106 = vector.multi_reduction <maximumf>, %105, %cst_39 [1] : vector<8x8xf32> to vector<8xf32>
    %107 = vector.shape_cast %106 : vector<8xf32> to vector<8x1xf32>
    %108 = vector.broadcast %107 : vector<8x1xf32> to vector<8x8xf32>
    %109 = arith.subf %105, %108 : vector<8x8xf32>
    %110 = math.exp %109 : vector<8x8xf32>
    %cst_40 = arith.constant dense<0.000000e+00> : vector<8xf32>
    %111 = vector.multi_reduction <add>, %110, %cst_40 [1] : vector<8x8xf32> to vector<8xf32>
    %112 = vector.shape_cast %111 : vector<8xf32> to vector<8x1xf32>
    %113 = tpu.reciprocal %112 {approx = true} : vector<8x1xf32> -> vector<8x1xf32>
    %114 = vector.broadcast %113 : vector<8x1xf32> to vector<8x8xf32>
    %115 = arith.mulf %110, %114 : vector<8x8xf32>
    %cst_41 = arith.constant dense<0.000000e+00> : vector<8x8xf32>
    %116 = tpu.matmul %115, %103, %cst_41 {dimension_numbers = #tpu.dot_dimension_numbers<[1], [0], [0], [1], [0, 0, 1, 1], [], []>} : vector<8x8xf32>, vector<8x8xf32>, vector<8x8xf32> -> vector<8x8xf32>
    %117 = vector.extract_strided_slice %18 {offsets = [8, 8], sizes = [8, 8], strides = [1, 1]} : vector<16x32xf32> to vector<8x8xf32>
    %118 = vector.extract_strided_slice %24 {offsets = [8, 8], sizes = [8, 8], strides = [1, 1]} : vector<16x32xf32> to vector<8x8xf32>
    %119 = vector.extract_strided_slice %31 {offsets = [8, 8], sizes = [8, 8], strides = [1, 1]} : vector<16x32xf32> to vector<8x8xf32>
    "tpu.trace_start"() <{level = 10 : i32, message = "qd,kd->qk"}> : () -> ()
    %cst_42 = arith.constant dense<0.000000e+00> : vector<8x8xf32>
    %120 = tpu.matmul %117, %118, %cst_42 {dimension_numbers = #tpu.dot_dimension_numbers<[1], [1], [0], [0], [0, 0, 1, 0], [], []>} : vector<8x8xf32>, vector<8x8xf32>, vector<8x8xf32> -> vector<8x8xf32>
    "tpu.trace_stop"() : () -> ()
    %121 = arith.addf %120, %100 : vector<8x8xf32>
    %cst_43 = arith.constant dense<0xFF800000> : vector<8xf32>
    %122 = vector.multi_reduction <maximumf>, %121, %cst_43 [1] : vector<8x8xf32> to vector<8xf32>
    %123 = vector.shape_cast %122 : vector<8xf32> to vector<8x1xf32>
    %124 = vector.broadcast %123 : vector<8x1xf32> to vector<8x8xf32>
    %125 = arith.subf %121, %124 : vector<8x8xf32>
    %126 = math.exp %125 : vector<8x8xf32>
    %cst_44 = arith.constant dense<0.000000e+00> : vector<8xf32>
    %127 = vector.multi_reduction <add>, %126, %cst_44 [1] : vector<8x8xf32> to vector<8xf32>
    %128 = vector.shape_cast %127 : vector<8xf32> to vector<8x1xf32>
    %129 = tpu.reciprocal %128 {approx = true} : vector<8x1xf32> -> vector<8x1xf32>
    %130 = vector.broadcast %129 : vector<8x1xf32> to vector<8x8xf32>
    %131 = arith.mulf %126, %130 : vector<8x8xf32>
    %cst_45 = arith.constant dense<0.000000e+00> : vector<8x8xf32>
    %132 = tpu.matmul %131, %119, %cst_45 {dimension_numbers = #tpu.dot_dimension_numbers<[1], [0], [0], [1], [0, 0, 1, 1], [], []>} : vector<8x8xf32>, vector<8x8xf32>, vector<8x8xf32> -> vector<8x8xf32>
    %133 = vector.extract_strided_slice %18 {offsets = [8, 16], sizes = [8, 8], strides = [1, 1]} : vector<16x32xf32> to vector<8x8xf32>
    %134 = vector.extract_strided_slice %24 {offsets = [8, 16], sizes = [8, 8], strides = [1, 1]} : vector<16x32xf32> to vector<8x8xf32>
    %135 = vector.extract_strided_slice %31 {offsets = [8, 16], sizes = [8, 8], strides = [1, 1]} : vector<16x32xf32> to vector<8x8xf32>
    "tpu.trace_start"() <{level = 10 : i32, message = "qd,kd->qk"}> : () -> ()
    %cst_46 = arith.constant dense<0.000000e+00> : vector<8x8xf32>
    %136 = tpu.matmul %133, %134, %cst_46 {dimension_numbers = #tpu.dot_dimension_numbers<[1], [1], [0], [0], [0, 0, 1, 0], [], []>} : vector<8x8xf32>, vector<8x8xf32>, vector<8x8xf32> -> vector<8x8xf32>
    "tpu.trace_stop"() : () -> ()
    %137 = arith.addf %136, %100 : vector<8x8xf32>
    %cst_47 = arith.constant dense<0xFF800000> : vector<8xf32>
    %138 = vector.multi_reduction <maximumf>, %137, %cst_47 [1] : vector<8x8xf32> to vector<8xf32>
    %139 = vector.shape_cast %138 : vector<8xf32> to vector<8x1xf32>
    %140 = vector.broadcast %139 : vector<8x1xf32> to vector<8x8xf32>
    %141 = arith.subf %137, %140 : vector<8x8xf32>
    %142 = math.exp %141 : vector<8x8xf32>
    %cst_48 = arith.constant dense<0.000000e+00> : vector<8xf32>
    %143 = vector.multi_reduction <add>, %142, %cst_48 [1] : vector<8x8xf32> to vector<8xf32>
    %144 = vector.shape_cast %143 : vector<8xf32> to vector<8x1xf32>
    %145 = tpu.reciprocal %144 {approx = true} : vector<8x1xf32> -> vector<8x1xf32>
    %146 = vector.broadcast %145 : vector<8x1xf32> to vector<8x8xf32>
    %147 = arith.mulf %142, %146 : vector<8x8xf32>
    %cst_49 = arith.constant dense<0.000000e+00> : vector<8x8xf32>
    %148 = tpu.matmul %147, %135, %cst_49 {dimension_numbers = #tpu.dot_dimension_numbers<[1], [0], [0], [1], [0, 0, 1, 1], [], []>} : vector<8x8xf32>, vector<8x8xf32>, vector<8x8xf32> -> vector<8x8xf32>
    %149 = vector.extract_strided_slice %18 {offsets = [8, 24], sizes = [8, 8], strides = [1, 1]} : vector<16x32xf32> to vector<8x8xf32>
    %150 = vector.extract_strided_slice %24 {offsets = [8, 24], sizes = [8, 8], strides = [1, 1]} : vector<16x32xf32> to vector<8x8xf32>
    %151 = vector.extract_strided_slice %31 {offsets = [8, 24], sizes = [8, 8], strides = [1, 1]} : vector<16x32xf32> to vector<8x8xf32>
    "tpu.trace_start"() <{level = 10 : i32, message = "qd,kd->qk"}> : () -> ()
    %cst_50 = arith.constant dense<0.000000e+00> : vector<8x8xf32>
    %152 = tpu.matmul %149, %150, %cst_50 {dimension_numbers = #tpu.dot_dimension_numbers<[1], [1], [0], [0], [0, 0, 1, 0], [], []>} : vector<8x8xf32>, vector<8x8xf32>, vector<8x8xf32> -> vector<8x8xf32>
    "tpu.trace_stop"() : () -> ()
    %153 = arith.addf %152, %100 : vector<8x8xf32>
    %cst_51 = arith.constant dense<0xFF800000> : vector<8xf32>
    %154 = vector.multi_reduction <maximumf>, %153, %cst_51 [1] : vector<8x8xf32> to vector<8xf32>
    %155 = vector.shape_cast %154 : vector<8xf32> to vector<8x1xf32>
    %156 = vector.broadcast %155 : vector<8x1xf32> to vector<8x8xf32>
    %157 = arith.subf %153, %156 : vector<8x8xf32>
    %158 = math.exp %157 : vector<8x8xf32>
    %cst_52 = arith.constant dense<0.000000e+00> : vector<8xf32>
    %159 = vector.multi_reduction <add>, %158, %cst_52 [1] : vector<8x8xf32> to vector<8xf32>
    %160 = vector.shape_cast %159 : vector<8xf32> to vector<8x1xf32>
    %161 = tpu.reciprocal %160 {approx = true} : vector<8x1xf32> -> vector<8x1xf32>
    %162 = vector.broadcast %161 : vector<8x1xf32> to vector<8x8xf32>
    %163 = arith.mulf %158, %162 : vector<8x8xf32>
    %cst_53 = arith.constant dense<0.000000e+00> : vector<8x8xf32>
    %164 = tpu.matmul %163, %151, %cst_53 {dimension_numbers = #tpu.dot_dimension_numbers<[1], [0], [0], [1], [0, 0, 1, 1], [], []>} : vector<8x8xf32>, vector<8x8xf32>, vector<8x8xf32> -> vector<8x8xf32>
    %165 = tpu.concatenate %116, %132, %148, %164 in 1 : vector<8x8xf32>, vector<8x8xf32>, vector<8x8xf32>, vector<8x8xf32> -> vector<8x32xf32>
    %166 = tpu.concatenate %98, %165 in 0 : vector<8x32xf32>, vector<8x32xf32> -> vector<16x32xf32>
    %167 = arith.truncf %166 : vector<16x32xf32> to vector<16x32xbf16>
    %c3 = arith.constant 3 : index
    %c0_54 = arith.constant 0 : index
    %c0_55 = arith.constant 0 : index
    %168 = vector.load %arg4[%c3, %c0_54, %c0_55] : memref<6x32x32xbf16, #tpu.memory_space<vmem>>, vector<1x32x32xbf16>
    %169 = vector.shape_cast %168 : vector<1x32x32xbf16> to vector<32x32xbf16>
    %cst_56 = arith.constant dense<0.000000e+00> : vector<16x32xf32>
    %170 = tpu.matmul %167, %169, %cst_56 {dimension_numbers = #tpu.dot_dimension_numbers<[1], [0], [0], [1], [0, 0, 1, 1], [], []>} : vector<16x32xbf16>, vector<32x32xbf16>, vector<16x32xf32> -> vector<16x32xf32>
    %171 = vector.broadcast %4 : vector<1x32xf32> to vector<16x32xf32>
    %172 = arith.addf %170, %171 : vector<16x32xf32>
    %173 = arith.addf %11, %172 : vector<16x32xf32>
    %cst_57 = arith.constant dense<0.000000e+00> : vector<16xf32>
    %174 = vector.multi_reduction <add>, %173, %cst_57 [1] : vector<16x32xf32> to vector<16xf32>
    %175 = vector.shape_cast %174 : vector<16xf32> to vector<16x1xf32>
    %cst_58 = arith.constant 3.200000e+01 : f32
    %176 = vector.broadcast %cst_58 : f32 to vector<16x1xf32>
    %177 = arith.divf %175, %176 : vector<16x1xf32>
    %178 = vector.broadcast %177 : vector<16x1xf32> to vector<16x32xf32>
    %179 = arith.subf %173, %178 : vector<16x32xf32>
    %180 = arith.mulf %179, %179 : vector<16x32xf32>
    %cst_59 = arith.constant dense<0.000000e+00> : vector<16xf32>
    %181 = vector.multi_reduction <add>, %180, %cst_59 [1] : vector<16x32xf32> to vector<16xf32>
    %182 = vector.shape_cast %181 : vector<16xf32> to vector<16x1xf32>
    %cst_60 = arith.constant 3.200000e+01 : f32
    %183 = vector.broadcast %cst_60 : f32 to vector<16x1xf32>
    %184 = arith.divf %182, %183 : vector<16x1xf32>
    %185 = vector.broadcast %177 : vector<16x1xf32> to vector<16x32xf32>
    %186 = arith.subf %173, %185 : vector<16x32xf32>
    %cst_61 = arith.constant 9.99999993E-9 : f32
    %187 = vector.broadcast %cst_61 : f32 to vector<16x1xf32>
    %188 = arith.addf %184, %187 : vector<16x1xf32>
    %189 = math.rsqrt %188 : vector<16x1xf32>
    %190 = vector.broadcast %189 : vector<16x1xf32> to vector<16x32xf32>
    %191 = arith.mulf %186, %190 : vector<16x32xf32>
    %192 = vector.broadcast %7 : vector<1x32xf32> to vector<16x32xf32>
    %193 = arith.mulf %191, %192 : vector<16x32xf32>
    %194 = vector.broadcast %8 : vector<1x32xf32> to vector<16x32xf32>
    %195 = arith.addf %193, %194 : vector<16x32xf32>
    %196 = arith.truncf %195 : vector<16x32xf32> to vector<16x32xbf16>
    %c4 = arith.constant 4 : index
    %c0_62 = arith.constant 0 : index
    %c0_63 = arith.constant 0 : index
    %197 = vector.load %arg4[%c4, %c0_62, %c0_63] : memref<6x32x32xbf16, #tpu.memory_space<vmem>>, vector<1x32x32xbf16>
    %198 = vector.shape_cast %197 : vector<1x32x32xbf16> to vector<32x32xbf16>
    %cst_64 = arith.constant dense<0.000000e+00> : vector<16x32xf32>
    %199 = tpu.matmul %196, %198, %cst_64 {dimension_numbers = #tpu.dot_dimension_numbers<[1], [0], [0], [1], [0, 0, 1, 1], [], []>} : vector<16x32xbf16>, vector<32x32xbf16>, vector<16x32xf32> -> vector<16x32xf32>
    %200 = vector.broadcast %5 : vector<1x32xf32> to vector<16x32xf32>
    %201 = arith.addf %199, %200 : vector<16x32xf32>
    %cst_65 = arith.constant 0.000000e+00 : f32
    %202 = vector.broadcast %cst_65 : f32 to vector<16x32xf32>
    %203 = arith.maximumf %201, %202 : vector<16x32xf32>
    %204 = arith.truncf %203 : vector<16x32xf32> to vector<16x32xbf16>
    %c5 = arith.constant 5 : index
    %c0_66 = arith.constant 0 : index
    %c0_67 = arith.constant 0 : index
    %205 = vector.load %arg4[%c5, %c0_66, %c0_67] : memref<6x32x32xbf16, #tpu.memory_space<vmem>>, vector<1x32x32xbf16>
    %206 = vector.shape_cast %205 : vector<1x32x32xbf16> to vector<32x32xbf16>
    %cst_68 = arith.constant dense<0.000000e+00> : vector<16x32xf32>
    %207 = tpu.matmul %204, %206, %cst_68 {dimension_numbers = #tpu.dot_dimension_numbers<[1], [0], [0], [1], [0, 0, 1, 1], [], []>} : vector<16x32xbf16>, vector<32x32xbf16>, vector<16x32xf32> -> vector<16x32xf32>
    %208 = vector.broadcast %6 : vector<1x32xf32> to vector<16x32xf32>
    %209 = arith.addf %207, %208 : vector<16x32xf32>
    %210 = arith.addf %195, %209 : vector<16x32xf32>
    %cst_69 = arith.constant dense<0.000000e+00> : vector<16xf32>
    %211 = vector.multi_reduction <add>, %210, %cst_69 [1] : vector<16x32xf32> to vector<16xf32>
    %212 = vector.shape_cast %211 : vector<16xf32> to vector<16x1xf32>
    %cst_70 = arith.constant 3.200000e+01 : f32
    %213 = vector.broadcast %cst_70 : f32 to vector<16x1xf32>
    %214 = arith.divf %212, %213 : vector<16x1xf32>
    %215 = vector.broadcast %214 : vector<16x1xf32> to vector<16x32xf32>
    %216 = arith.subf %210, %215 : vector<16x32xf32>
    %217 = arith.mulf %216, %216 : vector<16x32xf32>
    %cst_71 = arith.constant dense<0.000000e+00> : vector<16xf32>
    %218 = vector.multi_reduction <add>, %217, %cst_71 [1] : vector<16x32xf32> to vector<16xf32>
    %219 = vector.shape_cast %218 : vector<16xf32> to vector<16x1xf32>
    %cst_72 = arith.constant 3.200000e+01 : f32
    %220 = vector.broadcast %cst_72 : f32 to vector<16x1xf32>
    %221 = arith.divf %219, %220 : vector<16x1xf32>
    %222 = vector.broadcast %214 : vector<16x1xf32> to vector<16x32xf32>
    %223 = arith.subf %210, %222 : vector<16x32xf32>
    %cst_73 = arith.constant 9.99999993E-9 : f32
    %224 = vector.broadcast %cst_73 : f32 to vector<16x1xf32>
    %225 = arith.addf %221, %224 : vector<16x1xf32>
    %226 = math.rsqrt %225 : vector<16x1xf32>
    %227 = vector.broadcast %226 : vector<16x1xf32> to vector<16x32xf32>
    %228 = arith.mulf %223, %227 : vector<16x32xf32>
    %229 = vector.broadcast %9 : vector<1x32xf32> to vector<16x32xf32>
    %230 = arith.mulf %228, %229 : vector<16x32xf32>
    %231 = vector.broadcast %10 : vector<1x32xf32> to vector<16x32xf32>
    %232 = arith.addf %230, %231 : vector<16x32xf32>
    %c0_74 = arith.constant 0 : index
    %c0_75 = arith.constant 0 : index
    %233 = vector.load %arg6[%c0_74, %c0_75] : memref<16x32xf32, #tpu.memory_space<vmem>>, vector<16x32xf32>
    tpu.vector_store %arg6[%c0_74, %c0_75], %232 {strides = array<i32>} : memref<16x32xf32, #tpu.memory_space<vmem>>, vector<16x32xf32>,
    return
  }
}

</mosaic_0001>

<bundles_post_ra>
// kernel: tpu_custom_call.1
= control target key start
LH: loop header
LB: loop body
LE: loop exit
PB: predicated region body
PF: predicated region fallthrough
CT: control target
= control target key end

     0   :  { %11 = vsyncpa [#allocation3], 0  ;;  %s1597_s0 = inlined_call_operand.hbm [shape: f32[16,32], index: 0, kind: input, shape index: {}]   ;;  %s1598_s1 = inlined_call_operand.hbm [shape: f32[16,32], index: 1, kind: input, shape index: {}]   ;;  %s1599_s2 = inlined_call_operand.hbm [shape: f32[16,32], index: 2, kind: input, shape index: {}]   ;;  %s1600_s3 = inlined_call_operand.hbm [shape: f32[2,8,8], index: 3, kind: input, shape index: {}]   ;;  %s1601_s4 = inlined_call_operand.hbm [shape: bf16[6,32,32], index: 4, kind: input, shape index: {}]   ;;  %s1602_s5 = inlined_call_operand.hbm [shape: f32[10,32], index: 5, kind: input, shape index: {}]   ;;  %s1603_s6 = inlined_call_operand.hbm [shape: f32[16,32], index: 6, kind: output, shape index: {}]  }
   0x1   :  { %12 = vsyncpa [#allocation6], 0 }
   0x2   :  { %13 = vsyncpa [#allocation9], 0 }
   0x3   :  { %14 = vsyncpa [#allocation12], 0 }
   0x4   :  { %15 = vsyncpa [#allocation4], 0  ;;  %s33_s23 = sshll.u32 %s1598_s1, 4  ;;  %s1370_s24 = smov [#allocation5]   ;;  %s34_s23 = int_to_ptr.hbm [resolvable:$true] %s33_s23 }
   0x5   :  { %s35_s25 = sshll.u32 %s1370_s24, 4  ;;  %s59_s28 = sshll.u32 %s1600_s3, 4  ;;  %s36_s25 = int_to_ptr.vmem [resolvable:$true] %s35_s25  ;;  %s60_s28 = int_to_ptr.hbm [resolvable:$true] %s59_s28 }
   0x6   :  { %s1371_s29 = smov 128   ;;  %s1372_s30 = smov 8  }
   0x7   :  { %41 = dma.hbm_to_vmem [thread:$0]  %s34_s23, 256, %s36_s25, [#allocation6], %s1371_s29, %s1371_s29, %s1372_s30  }
   0x8   :  { %s1373_s7 = smov [#allocation8]   ;;  %s20_s1 = sshll.u32 %s1597_s0, 4  ;;  %s21_s1 = int_to_ptr.hbm [resolvable:$true] %s20_s1 }
   0x9   :  { %s61_s8 = sshll.u32 %s1373_s7, 4  ;;  %s46_s12 = sshll.u32 %s1599_s2, 4  ;;  %s62_s8 = int_to_ptr.vmem [resolvable:$true] %s61_s8  ;;  %s47_s12 = int_to_ptr.hbm [resolvable:$true] %s46_s12 }
   0xa   :  { %67 = dma.hbm_to_vmem [thread:$0]  %s60_s28, 256, %s62_s8, [#allocation9], %s1371_s29, %s1371_s29, %s1372_s30  }
   0xb   :  { %s1374_s13 = smov [#allocation2]   ;;  %s1375_s15 = smov [#allocation7]  }
   0xc   :  { %s22_s14 = sshll.u32 %s1374_s13, 4  ;;  %s48_s0 = sshll.u32 %s1375_s15, 4  ;;  %s23_s14 = int_to_ptr.vmem [resolvable:$true] %s22_s14  ;;  %s49_s0 = int_to_ptr.vmem [resolvable:$true] %s48_s0 }
   0xd   :  { %28 = dma.hbm_to_vmem [thread:$0]  %s21_s1, 256, %s23_s14, [#allocation3], %s1371_s29, %s1371_s29, %s1372_s30  }
   0xe   :  { %s72_s18 = sshll.u32 %s1601_s4, 4  ;;  %s1376_s2 = smov [#allocation10]   ;;  %s73_s18 = int_to_ptr.hbm [resolvable:$true] %s72_s18 }
   0xf   :  { %54 = dma.hbm_to_vmem [thread:$0]  %s47_s12, 256, %s49_s0, [#allocation6], %s1371_s29, %s1371_s29, %s1372_s30  }
  0x10   :  { %s74_s19 = sshll.u32 %s1376_s2, 4  ;;  %s85_s22 = sshll.u32 %s1602_s5, 4  ;;  %s75_s19 = int_to_ptr.vmem [resolvable:$true] %s74_s19  ;;  %s86_s22 = int_to_ptr.hbm [resolvable:$true] %s85_s22 }
  0x11   :  { %s1377_s23 = smov 64   ;;  %s1378_s24 = smov 4  }
  0x12   :  { %80 = dma.hbm_to_vmem [thread:$0]  %s73_s18, 1536, %s75_s19, [#allocation9], %s1377_s23, %s1377_s23, %s1378_s24  }
  0x13   :  { %s1379_s25 = smov [#allocation11]  }
  0x14   :  { %s87_s26 = sshll.u32 %s1379_s25, 4  ;;  %s88_s26 = int_to_ptr.vmem [resolvable:$true] %s87_s26 }
  0x15   :  { %93 = dma.hbm_to_vmem [thread:$0]  %s86_s22, 256, %s88_s26, [#allocation12], %s1371_s29, %s1371_s29, %s1372_s30  }
  0x16   :  { %1360 = dma.done.wait [#allocation3], 256  }
  0x17   :  { %1361 = vsyncadd [#allocation3], 4294967040 }
  0x18   :  { %1362 = dma.done.wait [#allocation6], 512  }
  0x19   :  { %1363 = vsyncadd [#allocation6], 4294966784 }
  0x1a   :  { %1364 = dma.done.wait [#allocation9], 1792  }
  0x1b   :  { %1365 = vsyncadd [#allocation9], 4294965504 }
  0x1c   :  { %1366 = dma.done.wait [#allocation12], 256  }
  0x1d   :  { %1367 = vsyncadd [#allocation12], 4294967040  ;;  %v1109_v0 = vld [vmem:[#allocation10 + $0x18] sm:$0xff]  ;;  %v1107_v1 = vld [vmem:[#allocation10 + $0x8] sm:$0xff]  ;;  %vm143_vm0 = vcmask 261120   ;;  %vm236_vm1 = vcmask 64512  }
  0x1e   :  { %v1108_v2 = vld [vmem:[#allocation10 + $0x10] sm:$0xff]  ;;  %v1106_v3 = vld [vmem:[#allocation10] sm:$0xff]  ;;  %v1457_v5 = vld [vmem:[#allocation5 + $0x8] sm:$0xff]  ;;  %189 = vmatpush.bf16.msra.mxu1 %v1109_v0  ;;  %153 = vmatpush.bf16.msra.mxu0 %v1107_v1  ;;  %s1380_s4 = smov 112   ;;  %s1381_s5 = smov 120   ;;  %vm506_vm2 = vcmask 130048  }
  0x1f   :  { %v1455_v4 = vld [vmem:[#allocation5] sm:$0xff]  ;;  %v123_v6 = vld [vmem:[#allocation2] sm:$0xff]  ;;  %v124_v7 = vld [vmem:[#allocation2 + $0x8] sm:$0xff]  ;;  %s1382_s27 = smov 104   ;;  %s1383_s28 = smov 16   ;;  %vm508_vm3 = vcmask 195584  }
  0x20   :  { %v1111_v8 = vld [vmem:[#allocation10 + $0x28] sm:$0xff]  ;;  %v1110_v9 = vld [vmem:[#allocation10 + $0x20] sm:$0xff]  ;;  %v161_v12 = vpack.c.bf16 %v1457_v5, %v1455_v4  ;;  %v125_v13 = vpack.c.bf16 %v124_v7, %v123_v6  ;;  %v1489_v31 = vld [vmem:[#allocation8] sm:$0xff]  ;;  %s1384_s7 = smov 24   ;;  %s1386_s8 = smov [#allocation13]  }
  0x21   :  { %227 = vmatpush.bf16.msra.mxu2 %v1111_v8  ;;  %v197_v10 = vld [vmem:[#allocation7] sm:$0xff]  ;;  %v198_v11 = vld [vmem:[#allocation7 + $0x8] sm:$0xff]  ;;  %v511_v54 = vld [vmem:[#allocation8 + $0x8] sm:$0xff]  ;;  %s1010_s9 = sshll.u32 %s1386_s8, 4  ;;  %s1012_s3 = sshll.u32 %s1603_s6, 4  ;;  %s1011_s9 = int_to_ptr.vmem [resolvable:$true] %s1010_s9  ;;  %s1013_s3 = int_to_ptr.hbm [resolvable:$true] %s1012_s3 }
  0x22   :  { %190 = vmatpush.bf16.msra.mxu1 %v1108_v2  ;;  %154 = vmatpush.bf16.msra.mxu0 %v1106_v3  ;;  %v199_v14 = vpack.c.bf16 %v198_v11, %v197_v10  ;;  %v1464_v15 = vld [vmem:[#allocation11] sm:$0xff] }
  0x23   :  { %v167_v16 = vperm.slane %v1464_v15, 1  ;;  %v130_v17 = vperm.slane %v1464_v15, 0  ;;  %v205_v26 = vperm.slane %v1464_v15, 2 }
  0x25   :  { %228 = vmatpush.bf16.msra.mxu2 %v1110_v9  ;;  %1045 = vmatmul.msk.bf16.vlgmr.msra.gmra.mxu1 %vm143_vm0, %v161_v12 }
  0x26   :  { %1036 = vmatmul.msk.bf16.vlgmr.msra.gmra.mxu0 %vm143_vm0, %v125_v13 }
  0x28   :  { %1054 = vmatmul.msk.bf16.vlgmr.msra.gmra.mxu2 %vm143_vm0, %v199_v14 }
  0xa2   :  { %v192_v18 = vpop.f32.mrf.mxu1 }
  0xa3   :  { %v193_v19 = vadd.f32 %v192_v18, %v167_v16  ;;  %v156_v20 = vpop.f32.mrf.mxu0 }
  0xa4   :  { %v157_v21 = vadd.f32 %v156_v20, %v130_v17 }
  0xa5   :  { %365 = vrot.lane.b32.xlu2 %v193_v19, %s1380_s4  ;;  %299 = vrot.lane.b32.xlu1 %v193_v19, %s1381_s5 }
  0xa6   :  { %1055 = vmatpush.xpose.msk.msrb.mxu0 %vm236_vm1, %v193_v19 }
  0xa9   :  { %1056 = vmatmul.msk.f32.vlgmr.msrb.gmra.mxu0 %vm236_vm1, %v157_v21 }
  0xaa   :  { %v194_v22 = vpop.f32.mrf.mxu1 }
  0xab   :  { %v195_v23 = vadd.f32 %v194_v22, %v167_v16  ;;  %v158_v24 = vpop.f32.mrf.mxu0  ;;  %v230_v27 = vpop.f32.mrf.mxu2 }
  0xac   :  { %v159_v25 = vadd.f32 %v158_v24, %v130_v17  ;;  %v1483_v28 = vadd.f32 %v230_v27, %v205_v26 }
  0xad   :  { %430 = vrot.lane.b32.xlu2 %v193_v19, %s1382_s27  ;;  %297 = vrot.lane.b32.xlu1 %v157_v21, %s1381_s5 }
  0xae   :  { %292 = vmatpush.msra.mxu3 %v1483_v28 }
  0xb5   :  { %574 = vrot.lane.b32.xlu2 %v195_v23, %s1381_s5  ;;  %428 = vrot.lane.b32.xlu1 %v157_v21, %s1382_s27 }
  0xbd   :  { %640 = vrot.lane.b32.xlu2 %v195_v23, %s1380_s4  ;;  %572 = vrot.lane.b32.xlu1 %v159_v25, %s1381_s5 }
  0xc5   :  { %638 = vrot.lane.b32.xlu2 %v159_v25, %s1380_s4  ;;  %705 = vrot.lane.b32.xlu1 %v195_v23, %s1382_s27 }
  0xff   :  { %v366_v29 = vpop.permute.xlu2 %365 }
 0x100   :  { %1061 = vmatpush.xpose.msk.msrb.mxu1 %vm236_vm1, %v366_v29 }
 0x104   :  { %1067 = vmatpush.xpose.msk.msra.mxu1 %vm236_vm1, %v195_v23 }
 0x107   :  { %v431_v35 = vpop.permute.xlu2 %430 }
 0x10f   :  { %v575_v39 = vpop.permute.xlu2 %574 }
 0x117   :  { %v300_v30 = vpop.permute.xlu1 %299  ;;  %v641_v43 = vpop.permute.xlu2 %640 }
 0x118   :  { %1058 = vmatpush.xpose.msk.msrb.mxu3 %vm236_vm1, %v300_v30 }
 0x11f   :  { %v639_v44 = vpop.permute.xlu2 %638  ;;  %v298_v45 = vpop.permute.xlu1 %297 }
 0x126   :  { %v260_v32 = vpop.f32.mrf.mxu0 }
 0x127   :  { %v261_v33 = vadd.f32 %v260_v32, %v1489_v31  ;;  %v429_v47 = vpop.permute.xlu1 %428 }
 0x129   :  { %v263_v34 = vsel %vm236_vm1, %v261_v33, -inf }
 0x12a   :  { %264 = vmax.xlane.f32.xlu0 %v263_v34 }
 0x12f   :  { %v573_v50 = vpop.permute.xlu1 %572 }
 0x137   :  { %v706_v56 = vpop.permute.xlu1 %705 }
 0x13e   :  { %363 = vrot.lane.b32.xlu0 %v157_v21, %s1380_s4 }
 0x19d   :  { %v265_v36 = vpop.xlane.xlu0 %264 }
 0x19e   :  { %v266_v37 = vsub.f32 %v261_v33, %v265_v36 }
 0x1a0   :  { %v267_v38 = vmul.f32 1.442695, %v266_v37 }
 0x1a2   :  { %1150 = vpow2.f32 %v267_v38 }
 0x1a8   :  { %v1151_v40 = vpop.eup %1150 }
 0x1a9   :  { %v269_v41 = vsel %vm236_vm1, %v1151_v40, 0.0 }
 0x1aa   :  { %270 = vadd.xlane.f32.xlu0 %v269_v41 }
 0x1b0   :  { %v364_v42 = vpop.permute.xlu0 %363 }
 0x1b1   :  { %1062 = vmatmul.msk.f32.vlgmr.msrb.gmra.mxu1 %vm236_vm1, %v364_v42 }
 0x1b2   :  { %1073 = vmatpush.xpose.msk.msrb.mxu1 %vm236_vm1, %v641_v43 }
 0x1b9   :  { %1068 = vmatmul.msk.f32.vlgmr.msra.gmra.mxu1 %vm236_vm1, %v159_v25 }
 0x1be   :  { %703 = vrot.lane.b32.xlu0 %v159_v25, %s1382_s27 }
 0x1c1   :  { %1074 = vmatmul.msk.f32.vlgmr.msrb.gmra.mxu1 %vm236_vm1, %v639_v44  ;;  %v232_v44 = vpop.f32.mrf.mxu2 }
 0x21d   :  { %v271_v46 = vpop.xlane.xlu0 %270 }
 0x21e   :  { %1152 = vrcp.f32 %v271_v46 }
 0x224   :  { %v1153_v48 = vpop.eup %1152 }
 0x225   :  { %v273_v49 = vmul.f32 %v1153_v48, %v1151_v40 }
 0x227   :  { %1057 = vmatmul.msk.f32.vlgmr.msra.gmra.mxu3 %vm236_vm1, %v273_v49 }
 0x228   :  { %1064 = vmatpush.xpose.msk.msra.mxu3 %vm236_vm1, %v431_v35 }
 0x22e   :  { %v388_v51 = vpop.f32.mrf.mxu1 }
 0x22f   :  { %v389_v52 = vadd.f32 %v388_v51, %v1489_v31  ;;  %1059 = vmatmul.msk.f32.vlgmr.msrb.gmra.mxu3 %vm236_vm1, %v298_v45  ;;  %v233_v45 = vadd.f32 %v232_v44, %v205_v26 }
 0x230   :  { %1070 = vmatpush.xpose.msk.msrb.mxu3 %vm236_vm1, %v575_v39  ;;  %v704_v62 = vpop.permute.xlu0 %703 }
 0x231   :  { %v391_v53 = vsel %vm236_vm1, %v389_v52, -inf }
 0x232   :  { %392 = vmax.xlane.f32.xlu2 %v391_v53 }
 0x236   :  { %v535_v55 = vpop.f32.mrf.mxu1 }
 0x237   :  { %v536_v57 = vadd.f32 %v535_v55, %v511_v54  ;;  %1065 = vmatmul.msk.f32.vlgmr.msra.gmra.mxu3 %vm236_vm1, %v429_v47 }
 0x238   :  { %1076 = vmatpush.xpose.msk.msra.mxu3 %vm236_vm1, %v706_v56 }
 0x239   :  { %v538_v58 = vsel %vm236_vm1, %v536_v57, -inf }
 0x23a   :  { %539 = vmax.xlane.f32.xlu2 %v538_v58 }
 0x23e   :  { %v663_v59 = vpop.f32.mrf.mxu1 }
 0x23f   :  { %v1509_v60 = vadd.f32 %v663_v59, %v511_v54  ;;  %1071 = vmatmul.msk.f32.vlgmr.msrb.gmra.mxu3 %vm236_vm1, %v573_v50 }
 0x241   :  { %v666_v61 = vsel %vm236_vm1, %v1509_v60, -inf }
 0x242   :  { %667 = vmax.xlane.f32.xlu0 %v666_v61 }
 0x247   :  { %1077 = vmatmul.msk.f32.vlgmr.msra.gmra.mxu3 %vm236_vm1, %v704_v62 }
 0x2a5   :  { %v393_v63 = vpop.xlane.xlu2 %392 }
 0x2a6   :  { %v394_v0 = vsub.f32 %v389_v52, %v393_v63 }
 0x2a8   :  { %v395_v1 = vmul.f32 1.442695, %v394_v0 }
 0x2aa   :  { %1154 = vpow2.f32 %v395_v1  ;;  %v1515_v2 = vpop.f32.mrf.mxu3 }
 0x2ad   :  { %v540_v6 = vpop.xlane.xlu2 %539 }
 0x2ae   :  { %v541_v10 = vsub.f32 %v536_v57, %v540_v6 }
 0x2b0   :  { %v1517_v3 = vpop.eup %1154  ;;  %v542_v12 = vmul.f32 1.442695, %v541_v10 }
 0x2b1   :  { %v397_v7 = vsel %vm236_vm1, %v1517_v3, 0.0 }
 0x2b2   :  { %398 = vadd.xlane.f32.xlu0 %v397_v7  ;;  %v322_v8 = vpop.f32.mrf.mxu3  ;;  %1156 = vpow2.f32 %v542_v12 }
 0x2b3   :  { %v323_v9 = vadd.f32 %v322_v8, %v1489_v31 }
 0x2b5   :  { %v325_v11 = vsel %vm236_vm1, %v323_v9, -inf  ;;  %v668_v25 = vpop.xlane.xlu0 %667 }
 0x2b6   :  { %326 = vmax.xlane.f32.xlu1 %v325_v11  ;;  %v669_v46 = vsub.f32 %v1509_v60, %v668_v25 }
 0x2b8   :  { %v1525_v17 = vpop.eup %1156  ;;  %v670_v48 = vmul.f32 1.442695, %v669_v46 }
 0x2b9   :  { %v544_v20 = vsel %vm236_vm1, %v1525_v17, 0.0 }
 0x2ba   :  { %v453_v13 = vpop.f32.mrf.mxu3 }
 0x2bb   :  { %v454_v14 = vadd.f32 %v453_v13, %v1489_v31 }
 0x2bd   :  { %v456_v16 = vsel %vm236_vm1, %v454_v14, -inf }
 0x2be   :  { %457 = vmax.xlane.f32.xlu0 %v456_v16 }
 0x2c2   :  { %v597_v18 = vpop.f32.mrf.mxu3 }
 0x2c3   :  { %v598_v19 = vadd.f32 %v597_v18, %v511_v54 }
 0x2c5   :  { %v600_v21 = vsel %vm236_vm1, %v598_v19, -inf }
 0x2c6   :  { %545 = vadd.xlane.f32.xlu0 %v544_v20  ;;  %601 = vmax.xlane.f32.xlu1 %v600_v21 }
 0x2ca   :  { %v728_v22 = vpop.f32.mrf.mxu3 }
 0x2cb   :  { %v729_v23 = vadd.f32 %v728_v22, %v511_v54 }
 0x2cd   :  { %v731_v24 = vsel %vm236_vm1, %v729_v23, -inf }
 0x2ce   :  { %732 = vmax.xlane.f32.xlu2 %v731_v24 }
 0x2da   :  { %467 = vrot.lane.b32.xlu0 %v1483_v28, %s1382_s27 }
 0x325   :  { %v399_v27 = vpop.xlane.xlu0 %398 }
 0x329   :  { %v327_v29 = vpop.xlane.xlu1 %326 }
 0x32a   :  { %v328_v30 = vsub.f32 %v323_v9, %v327_v29 }
 0x32c   :  { %v329_v31 = vmul.f32 1.442695, %v328_v30 }
 0x32e   :  { %1158 = vpow2.f32 %v329_v31  ;;  %v1113_v31 = vld [vmem:[#allocation10 + $0x38] sm:$0xff] }
 0x32f   :  { %811 = vmatpush.bf16.msra.mxu1 %v1113_v31 }
 0x331   :  { %v458_v32 = vpop.xlane.xlu0 %457 }
 0x332   :  { %v459_v33 = vsub.f32 %v454_v14, %v458_v32  ;;  %v1112_v32 = vld [vmem:[#allocation10 + $0x30] sm:$0xff] }
 0x333   :  { %812 = vmatpush.bf16.msra.mxu1 %v1112_v32  ;;  %v872_v32 = vperm.slane %v1464_v15, 6 }
 0x334   :  { %v1159_v34 = vpop.eup %1158  ;;  %v460_v35 = vmul.f32 1.442695, %v459_v33 }
 0x335   :  { %v331_v36 = vsel %vm236_vm1, %v1159_v34, 0.0 }
 0x336   :  { %1160 = vpow2.f32 %v460_v35  ;;  %332 = vadd.xlane.f32.xlu1 %v331_v36 }
 0x339   :  { %v602_v37 = vpop.xlane.xlu1 %601  ;;  %v546_v54 = vpop.xlane.xlu0 %545 }
 0x33a   :  { %v603_v38 = vsub.f32 %v598_v19, %v602_v37 }
 0x33c   :  { %v1161_v39 = vpop.eup %1160  ;;  %v604_v40 = vmul.f32 1.442695, %v603_v38 }
 0x33d   :  { %v462_v41 = vsel %vm236_vm1, %v1161_v39, 0.0 }
 0x33e   :  { %1162 = vpow2.f32 %v604_v40  ;;  %463 = vadd.xlane.f32.xlu2 %v462_v41 }
 0x33f   :  { %1164 = vpow2.f32 %v670_v48 }
 0x341   :  { %v733_v47 = vpop.xlane.xlu2 %732 }
 0x342   :  { %v734_v49 = vsub.f32 %v729_v23, %v733_v47 }
 0x344   :  { %v1163_v42 = vpop.eup %1162  ;;  %v735_v50 = vmul.f32 1.442695, %v734_v49  ;;  %v789_v49 = vperm.slane %v1464_v15, 3 }
 0x345   :  { %v606_v43 = vsel %vm236_vm1, %v1163_v42, 0.0  ;;  %v1165_v51 = vpop.eup %1164 }
 0x346   :  { %607 = vadd.xlane.f32.xlu0 %v606_v43  ;;  %1166 = vpow2.f32 %v735_v50 }
 0x347   :  { %1168 = vrcp.f32 %v399_v27 }
 0x348   :  { %1170 = vrcp.f32 %v546_v54 }
 0x34c   :  { %v1167_v52 = vpop.eup %1166  ;;  %v468_v59 = vpop.permute.xlu0 %467 }
 0x34d   :  { %v737_v26 = vsel %vm236_vm1, %v1167_v52, 0.0  ;;  %v1169_v56 = vpop.eup %1168 }
 0x34e   :  { %v401_v58 = vmul.f32 %v1169_v56, %v1517_v3  ;;  %v1171_v60 = vpop.eup %1170 }
 0x34f   :  { %337 = vrot.lane.b32.xlu1 %v1483_v28, %s1381_s5  ;;  %v548_v62 = vmul.f32 %v1171_v60, %v1525_v17 }
 0x356   :  { %402 = vrot.lane.b32.xlu2 %v1483_v28, %s1380_s4  ;;  %v672_v28 = vsel %vm236_vm1, %v1165_v51, 0.0 }
 0x35a   :  { %612 = vrot.lane.b32.xlu0 %v233_v45, %s1381_s5 }
 0x362   :  { %677 = vrot.lane.b32.xlu0 %v233_v45, %s1380_s4 }
 0x36a   :  { %742 = vrot.lane.b32.xlu0 %v233_v45, %s1382_s27 }
 0x379   :  { %673 = vadd.xlane.f32.xlu1 %v672_v28 }
 0x37f   :  { %738 = vadd.xlane.f32.xlu2 %v737_v26 }
 0x3a9   :  { %v333_v55 = vpop.xlane.xlu1 %332 }
 0x3aa   :  { %1172 = vrcp.f32 %v333_v55  ;;  %v1385_v55 = vmov 32.0  }
 0x3b0   :  { %v1173_v61 = vpop.eup %1172 }
 0x3b1   :  { %v464_v53 = vpop.xlane.xlu2 %463  ;;  %v335_v63 = vmul.f32 %v1173_v61, %v1159_v34 }
 0x3b2   :  { %1174 = vrcp.f32 %v464_v53 }
 0x3b8   :  { %v1175_v3 = vpop.eup %1174 }
 0x3b9   :  { %v403_v57 = vpop.permute.xlu2 %402  ;;  %v608_v1 = vpop.xlane.xlu0 %607  ;;  %v466_v6 = vmul.f32 %v1175_v3, %v1161_v39 }
 0x3ba   :  { %423 = vmatpush.msrb.mxu2 %v403_v57  ;;  %1176 = vrcp.f32 %v608_v1 }
 0x3bb   :  { %1063 = vmatmul.msk.f32.vlgmr.msrb.gmra.mxu2 %vm236_vm1, %v401_v58 }
 0x3bc   :  { %567 = vmatpush.msra.mxu2 %v233_v45 }
 0x3c0   :  { %v1177_v8 = vpop.eup %1176 }
 0x3c1   :  { %v338_v0 = vpop.permute.xlu1 %337  ;;  %v610_v9 = vmul.f32 %v1177_v8, %v1163_v42 }
 0x3c2   :  { %358 = vmatpush.msra.mxu0 %v338_v0 }
 0x3c3   :  { %1060 = vmatmul.msk.f32.vlgmr.msra.gmra.mxu0 %vm236_vm1, %v335_v63  ;;  %1069 = vmatmul.msk.f32.vlgmr.msra.gmra.mxu2 %vm236_vm1, %v548_v62 }
 0x3c4   :  { %488 = vmatpush.msrb.mxu0 %v468_v59 }
 0x3cb   :  { %1066 = vmatmul.msk.f32.vlgmr.msrb.gmra.mxu0 %vm236_vm1, %v466_v6 }
 0x3cc   :  { %v613_v7 = vpop.permute.xlu0 %612 }
 0x3cd   :  { %633 = vmatpush.msra.mxu0 %v613_v7 }
 0x3d3   :  { %1072 = vmatmul.msk.f32.vlgmr.msra.gmra.mxu0 %vm236_vm1, %v610_v9  ;;  %v1115_v9 = vld [vmem:[#allocation10 + $0x48] sm:$0xff] }
 0x3d4   :  { %v678_v10 = vpop.permute.xlu0 %677 }
 0x3d5   :  { %698 = vmatpush.msrb.mxu2 %v678_v10 }
 0x3d7   :  { %906 = vmatpush.bf16.msra.mxu2 %v1115_v9 }
 0x3dc   :  { %v743_v11 = vpop.permute.xlu0 %742 }
 0x3dd   :  { %763 = vmatpush.msrb.mxu0 %v743_v11 }
 0x3ec   :  { %v674_v12 = vpop.xlane.xlu1 %673 }
 0x3ed   :  { %1178 = vrcp.f32 %v674_v12 }
 0x3f2   :  { %v739_v13 = vpop.xlane.xlu2 %738 }
 0x3f3   :  { %v1179_v14 = vpop.eup %1178  ;;  %1180 = vrcp.f32 %v739_v13  ;;  %v1114_v13 = vld [vmem:[#allocation10 + $0x40] sm:$0xff] }
 0x3f4   :  { %v676_v16 = vmul.f32 %v1179_v14, %v1165_v51  ;;  %1182 = vrcp.f32 %v1385_v55  ;;  %907 = vmatpush.bf16.msra.mxu2 %v1114_v13 }
 0x3f6   :  { %1075 = vmatmul.msk.f32.vlgmr.msrb.gmra.mxu2 %vm236_vm1, %v676_v16 }
 0x3f9   :  { %v1181_v17 = vpop.eup %1180 }
 0x3fa   :  { %v741_v18 = vmul.f32 %v1181_v17, %v1167_v52  ;;  %v1183_v56 = vpop.eup %1182 }
 0x3fb   :  { %v828_v57 = vmul.f32 32.0, %v1183_v56  ;;  %vm832_vm4 = vweird.f32 %v1183_v56 }
 0x3fc   :  { %1078 = vmatmul.msk.f32.vlgmr.msrb.gmra.mxu0 %vm236_vm1, %v741_v18 }
 0x3fd   :  { %v829_v58 = vsub.f32 1.0, %v828_v57 }
 0x3ff   :  { %v830_v59 = vmul.f32 %v1183_v56, %v829_v58 }
 0x401   :  { %v831_v60 = vadd.f32 %v1183_v56, %v830_v59 }
 0x403   :  { %v1567_v61 = vsel %vm832_vm4, %v1183_v56, %v831_v60 }
 0x43e   :  { %v425_v23 = vpop.f32.mrf.mxu2 }
 0x440   :  { %v360_v19 = vpop.f32.mrf.mxu0 }
 0x446   :  { %v569_v24 = vpop.f32.mrf.mxu2 }
 0x448   :  { %v490_v20 = vpop.f32.mrf.mxu0 }
 0x450   :  { %v635_v21 = vpop.f32.mrf.mxu0 }
 0x451   :  { %v1140_v22 = vpack.i.bf16 %v635_v21, %v360_v19 }
 0x453   :  { %1141 = vrot.lane.b32.xlu0 %v1140_v22, %s1372_s30 }
 0x479   :  { %v700_v25 = vpop.f32.mrf.mxu2  ;;  %v765_v27 = vpop.f32.mrf.mxu0 }
 0x47a   :  { %v1135_v29 = vpack.i.bf16 %v700_v25, %v425_v23  ;;  %v1145_v30 = vpack.i.bf16 %v765_v27, %v490_v20 }
 0x47c   :  { %1136 = vrot.lane.b32.xlu1 %v1135_v29, %s1383_s28  ;;  %1146 = vrot.lane.b32.xlu0 %v1145_v30, %s1384_s7 }
 0x4c5   :  { %v1142_v33 = vpop.permute.xlu0 %1141 }
 0x4c6   :  { %v1144_v34 = vunpack.i.h.bf16 %v1142_v33  ;;  %v1143_v35 = vunpack.i.l.bf16 %v1142_v33 }
 0x4c8   :  { %v780_v42 = vsel %vm236_vm1, %v569_v24, %v1144_v34  ;;  %v505_v43 = vsel %vm236_vm1, %v1515_v2, %v1143_v35 }
 0x4ee   :  { %v1137_v36 = vpop.permute.xlu1 %1136  ;;  %v1147_v37 = vpop.permute.xlu0 %1146 }
 0x4ef   :  { %v1139_v38 = vunpack.i.h.bf16 %v1137_v36  ;;  %v1138_v39 = vunpack.i.l.bf16 %v1137_v36  ;;  %v1149_v40 = vunpack.i.h.bf16 %v1147_v37  ;;  %v1148_v41 = vunpack.i.l.bf16 %v1147_v37 }
 0x4f0   :  { %v875_v36 = vperm.slane %v1464_v15, 7 }
 0x4f1   :  { %v507_v44 = vsel %vm506_vm2, %v505_v43, %v1138_v39  ;;  %v781_v45 = vsel %vm506_vm2, %v780_v42, %v1139_v38  ;;  %v1117_v43 = vld [vmem:[#allocation10 + $0x58] sm:$0xff] }
 0x4f2   :  { %v509_v46 = vsel %vm508_vm3, %v507_v44, %v1148_v41  ;;  %v782_v47 = vsel %vm508_vm3, %v781_v45, %v1149_v40  ;;  %944 = vmatpush.bf16.msrb.mxu3 %v1117_v43  ;;  %v1116_v44 = vld [vmem:[#allocation10 + $0x50] sm:$0xff] }
 0x4f3   :  { %v783_v48 = vpack.c.bf16 %v782_v47, %v509_v46  ;;  %v884_v46 = vperm.slane %v1464_v15, 4 }
 0x4f5   :  { %1087 = vmatmul.msk.bf16.vlgmr.msra.gmra.mxu1 %vm143_vm0, %v783_v48 }
 0x4f6   :  { %945 = vmatpush.bf16.msrb.mxu3 %v1116_v44 }
 0x572   :  { %v814_v50 = vpop.f32.mrf.mxu1 }
 0x573   :  { %v815_v51 = vadd.f32 %v814_v50, %v789_v49 }
 0x575   :  { %v819_v28 = vadd.f32 %v815_v51, %v1455_v4 }
 0x577   :  { %v821_v52 = vsel %vm143_vm0, %v819_v28, 0.0 }
 0x578   :  { %822 = vadd.xlane.f32.xlu2 %v821_v52  ;;  %v922_v52 = vperm.slane %v1464_v15, 5 }
 0x57a   :  { %v816_v26 = vpop.f32.mrf.mxu1 }
 0x57b   :  { %v817_v53 = vadd.f32 %v816_v26, %v789_v49 }
 0x57d   :  { %v820_v2 = vadd.f32 %v817_v53, %v1457_v5 }
 0x57f   :  { %v824_v54 = vsel %vm143_vm0, %v820_v2, 0.0 }
 0x580   :  { %825 = vadd.xlane.f32.xlu0 %v824_v54 }
 0x5eb   :  { %v823_v4 = vpop.xlane.xlu2 %822 }
 0x5ec   :  { %v834_v62 = vmul.f32 %v1567_v61, %v823_v4 }
 0x5ee   :  { %v836_v63 = vsub.f32 %v819_v28, %v834_v62 }
 0x5f0   :  { %v838_v0 = vmul.f32 %v836_v63, %v836_v63 }
 0x5f2   :  { %v840_v5 = vsel %vm143_vm0, %v838_v0, 0.0 }
 0x5f3   :  { %v826_v1 = vpop.xlane.xlu0 %825  ;;  %841 = vadd.xlane.f32.xlu2 %v840_v5 }
 0x5f4   :  { %v835_v3 = vmul.f32 %v1567_v61, %v826_v1 }
 0x5f6   :  { %v837_v6 = vsub.f32 %v820_v2, %v835_v3 }
 0x5f8   :  { %v839_v7 = vmul.f32 %v837_v6, %v837_v6 }
 0x5fa   :  { %v843_v8 = vsel %vm143_vm0, %v839_v7, 0.0 }
 0x5fb   :  { %844 = vadd.xlane.f32.xlu2 %v843_v8 }
 0x666   :  { %v842_v10 = vpop.xlane.xlu2 %841 }
 0x667   :  { %v846_v11 = vmul.f32 %v842_v10, %v1567_v61 }
 0x669   :  { %v848_v12 = vadd.f32 1e-08, %v846_v11 }
 0x66b   :  { %1184 = vrsqrt.f32 %v848_v12  ;;  %vm856_vm6 = vweird.f32 %v848_v12 }
 0x66e   :  { %v845_v14 = vpop.xlane.xlu2 %844 }
 0x66f   :  { %v847_v16 = vmul.f32 %v845_v14, %v1567_v61 }
 0x671   :  { %v1185_v17 = vpop.eup %1184  ;;  %v849_v18 = vadd.f32 1e-08, %v847_v16 }
 0x672   :  { %v851_v19 = vmul.f32 %v1185_v17, %v848_v12  ;;  %vm857_vm5 = vweird.f32 %v1185_v17 }
 0x673   :  { %1186 = vrsqrt.f32 %v849_v18  ;;  %vm858_vm7 = vmor %vm856_vm6, %vm857_vm5  ;;  %vm866_vm9 = vweird.f32 %v849_v18 }
 0x674   :  { %v852_v20 = vmul.f32 %v1185_v17, %v851_v19 }
 0x676   :  { %v853_v21 = vmul.f32 0.5, %v852_v20 }
 0x678   :  { %v854_v22 = vsub.f32 1.5, %v853_v21 }
 0x679   :  { %v1187_v23 = vpop.eup %1186 }
 0x67a   :  { %v855_v24 = vmul.f32 %v1185_v17, %v854_v22  ;;  %v861_v25 = vmul.f32 %v1187_v23, %v849_v18  ;;  %vm867_vm8 = vweird.f32 %v1187_v23 }
 0x67b   :  { %vm868_vm10 = vmor %vm866_vm9, %vm867_vm8 }
 0x67c   :  { %v862_v27 = vmul.f32 %v1187_v23, %v861_v25  ;;  %v859_v29 = vsel %vm858_vm7, %v1185_v17, %v855_v24  ;;  %v120_v17 = vld [vmem:[#allocation11 + $0x8] sm:$0x3] }
 0x67d   :  { %v870_v33 = vmul.f32 %v859_v29, %v836_v63  ;;  %v998_v22 = vperm.slane %v120_v17, 0 }
 0x67e   :  { %v863_v30 = vmul.f32 0.5, %v862_v27  ;;  %v1001_v27 = vperm.slane %v120_v17, 1 }
 0x67f   :  { %v873_v37 = vmul.f32 %v872_v32, %v870_v33 }
 0x680   :  { %v864_v31 = vsub.f32 1.5, %v863_v30 }
 0x681   :  { %v876_v40 = vadd.f32 %v875_v36, %v873_v37 }
 0x682   :  { %v865_v34 = vmul.f32 %v1187_v23, %v864_v31 }
 0x684   :  { %v869_v35 = vsel %vm868_vm10, %v1187_v23, %v865_v34 }
 0x685   :  { %v871_v38 = vmul.f32 %v869_v35, %v837_v6 }
 0x687   :  { %v874_v39 = vmul.f32 %v872_v32, %v871_v38 }
 0x689   :  { %v877_v41 = vadd.f32 %v875_v36, %v874_v39 }
 0x68b   :  { %v878_v42 = vpack.c.bf16 %v877_v41, %v876_v40 }
 0x68d   :  { %1096 = vmatmul.msk.bf16.vlgmr.msra.gmra.mxu2 %vm143_vm0, %v878_v42 }
 0x710   :  { %v909_v45 = vpop.f32.mrf.mxu2 }
 0x711   :  { %v910_v47 = vadd.f32 %v909_v45, %v884_v46 }
 0x713   :  { %v914_v50 = vmax.f32 %v910_v47, 0.0 }
 0x718   :  { %v911_v48 = vpop.f32.mrf.mxu2 }
 0x719   :  { %v912_v49 = vadd.f32 %v911_v48, %v884_v46 }
 0x71b   :  { %v915_v51 = vmax.f32 %v912_v49, 0.0 }
 0x71d   :  { %v916_v28 = vpack.c.bf16 %v915_v51, %v914_v50 }
 0x71f   :  { %1105 = vmatmul.msk.bf16.vlgmr.msrb.gmra.mxu3 %vm143_vm0, %v916_v28 }
 0x7a2   :  { %v947_v26 = vpop.f32.mrf.mxu3 }
 0x7a3   :  { %v948_v53 = vadd.f32 %v947_v26, %v922_v52 }
 0x7a5   :  { %v952_v2 = vadd.f32 %v948_v53, %v876_v40 }
 0x7a7   :  { %v954_v54 = vsel %vm143_vm0, %v952_v2, 0.0 }
 0x7a8   :  { %955 = vadd.xlane.f32.xlu1 %v954_v54 }
 0x7aa   :  { %v949_v55 = vpop.f32.mrf.mxu3 }
 0x7ab   :  { %v950_v56 = vadd.f32 %v949_v55, %v922_v52 }
 0x7ad   :  { %v953_v57 = vadd.f32 %v950_v56, %v877_v41 }
 0x7af   :  { %v957_v58 = vsel %vm143_vm0, %v953_v57, 0.0 }
 0x7b0   :  { %958 = vadd.xlane.f32.xlu2 %v957_v58 }
 0x81b   :  { %v956_v59 = vpop.xlane.xlu1 %955 }
 0x81c   :  { %v960_v60 = vmul.f32 %v956_v59, %v1567_v61 }
 0x81e   :  { %v962_v4 = vsub.f32 %v952_v2, %v960_v60 }
 0x820   :  { %v964_v62 = vmul.f32 %v962_v4, %v962_v4 }
 0x822   :  { %v966_v63 = vsel %vm143_vm0, %v964_v62, 0.0 }
 0x823   :  { %v959_v15 = vpop.xlane.xlu2 %958  ;;  %967 = vadd.xlane.f32.xlu2 %v966_v63 }
 0x824   :  { %v961_v0 = vmul.f32 %v959_v15, %v1567_v61 }
 0x826   :  { %v963_v5 = vsub.f32 %v953_v57, %v961_v0 }
 0x828   :  { %v965_v1 = vmul.f32 %v963_v5, %v963_v5 }
 0x82a   :  { %v969_v3 = vsel %vm143_vm0, %v965_v1, 0.0 }
 0x82b   :  { %970 = vadd.xlane.f32.xlu2 %v969_v3 }
 0x896   :  { %v968_v6 = vpop.xlane.xlu2 %967 }
 0x897   :  { %v972_v7 = vmul.f32 %v968_v6, %v1567_v61 }
 0x899   :  { %v974_v8 = vadd.f32 1e-08, %v972_v7 }
 0x89b   :  { %1188 = vrsqrt.f32 %v974_v8  ;;  %vm982_vm12 = vweird.f32 %v974_v8 }
 0x89e   :  { %v971_v9 = vpop.xlane.xlu2 %970 }
 0x89f   :  { %v973_v10 = vmul.f32 %v971_v9, %v1567_v61 }
 0x8a1   :  { %v1189_v11 = vpop.eup %1188  ;;  %v975_v12 = vadd.f32 1e-08, %v973_v10 }
 0x8a2   :  { %v977_v13 = vmul.f32 %v1189_v11, %v974_v8  ;;  %vm983_vm11 = vweird.f32 %v1189_v11 }
 0x8a3   :  { %1190 = vrsqrt.f32 %v975_v12  ;;  %vm984_vm13 = vmor %vm982_vm12, %vm983_vm11  ;;  %vm992_vm15 = vweird.f32 %v975_v12 }
 0x8a4   :  { %v978_v14 = vmul.f32 %v1189_v11, %v977_v13 }
 0x8a6   :  { %v979_v16 = vmul.f32 0.5, %v978_v14 }
 0x8a8   :  { %v980_v18 = vsub.f32 1.5, %v979_v16 }
 0x8a9   :  { %v1191_v19 = vpop.eup %1190 }
 0x8aa   :  { %v981_v20 = vmul.f32 %v1189_v11, %v980_v18  ;;  %v987_v21 = vmul.f32 %v1191_v19, %v975_v12  ;;  %vm993_vm14 = vweird.f32 %v1191_v19 }
 0x8ab   :  { %vm994_vm1 = vmor %vm992_vm15, %vm993_vm14 }
 0x8ac   :  { %v985_v23 = vsel %vm984_vm13, %v1189_v11, %v981_v20  ;;  %v988_v24 = vmul.f32 %v1191_v19, %v987_v21 }
 0x8ad   :  { %v996_v25 = vmul.f32 %v985_v23, %v962_v4 }
 0x8ae   :  { %v989_v61 = vmul.f32 0.5, %v988_v24 }
 0x8af   :  { %v999_v29 = vmul.f32 %v998_v22, %v996_v25 }
 0x8b0   :  { %v990_v30 = vsub.f32 1.5, %v989_v61 }
 0x8b1   :  { %v1002_v31 = vadd.f32 %v1001_v27, %v999_v29 }
 0x8b2   :  { %v991_v32 = vmul.f32 %v1191_v19, %v990_v30 }
 0x8b3   :  { %1004 = vst.msk [vmem:[#allocation13] sm:$0xff] %vm143_vm0, %v1002_v31 }
 0x8b4   :  { %v995_v33 = vsel %vm994_vm1, %v1191_v19, %v991_v32 }
 0x8b5   :  { %v997_v34 = vmul.f32 %v995_v33, %v963_v5 }
 0x8b7   :  { %v1000_v35 = vmul.f32 %v998_v22, %v997_v34 }
 0x8b9   :  { %v1003_v36 = vadd.f32 %v1001_v27, %v1000_v35 }
 0x8bb   :  { %1005 = vst.msk [vmem:[#allocation13 + $0x8] sm:$0xff] %vm143_vm0, %v1003_v36 }
 0x8bc   :  { %1018 = dma.vmem_to_hbm [thread:$0]  %s1011_s9, 256, %s1013_s3, [#allocation4], %s1371_s29, %s1371_s29, %s1372_s30  }
 0x8bd   :  { %1368 = dma.done.wait [#allocation4], 256  }
 0x8be   :  { %1369 = vsyncadd [#allocation4], 4294967040 }
 0x8bf   :  { %1023 = vsyncpa [#allocation3], 1 }
 0x8c0   :  { %1024 = vsyncpa [#allocation6], 1 }
 0x8c1   :  { %1025 = vsyncpa [#allocation9], 1 }
 0x8c2   :  { %1026 = vsyncpa [#allocation12], 1 }
 0x8c3   :  { %1027 = vsyncpa [#allocation4], 1 }

</bundles_post_ra>
